<compile_context>
chip_gen: v7x
topology: tpu7x:2x2x1
jax: 0.10.0
libtpu: 0.0.40
codegen_flags: <defaults>
</compile_context>

<pallas_src>
import functools

import jax
import jax.numpy as jnp
from jax import lax
from jax.experimental import pallas as pl
from jax.experimental.pallas import tpu as pltpu

_MIB = 1024 * 1024


def _vmem_capacity_bytes() -> int:
    """Physical VMEM per core; conservative (v7x) fallback if unavailable."""
    try:
        cap = int(getattr(pltpu.get_tpu_info(), "vmem_capacity_bytes", 0))
        if cap > 0:
            return cap
    except Exception:
        pass
    return 64 * _MIB  # v7x floor; v5e/v6e have 128 MiB


def _nll_loss_kernel(pred_ref, target_ref, out_ref, *, n_rows, tile_n,
                     tiles_per_core, group, from_logits):
    # pred_ref:   (tile_n, group*C)  log-probs (or raw logits), native dtype
    # target_ref: (tile_n, group)    int32 flat packed-column indices (-1 = none)
    # out_ref:    (1, 8, 128) f32    this core-split's running partial sum
    c_idx = pl.program_id(0)   # core-split index        ("parallel")
    t_idx = pl.program_id(1)   # tile within the split   ("arbitrary")

    @pl.when(t_idx == 0)
    def _init():
        out_ref[...] = jnp.zeros_like(out_ref)

    x = pred_ref[...].astype(jnp.float32)     # in-vreg upcast (bf16 -> f32)
    tgt = target_ref[...]                     # (tile_n, group) int32
    tn, width = x.shape

    # Global packed-row ids from the *unclamped* linear tile id: tiles past the
    # end (ragged tail, or the clamped spare tile of the parallel split) mask
    # to a zero contribution.
    tile_lin = c_idx * tiles_per_core + t_idx
    row_ids = tile_lin * tile_n + lax.broadcasted_iota(jnp.int32, (tn, 1), 0)
    row_valid = row_ids < n_rows              # (tile_n, 1)

    # One-hot "gather" of pred[i, target[i]]: lane-id compare, no dynamic gather.
    col_ids = lax.broadcasted_iota(jnp.int32, (tn, width), 1)
    hit = col_ids == tgt[:, 0:1]
    for j in range(1, group):                 # disjoint column ranges per sub-row
        hit = hit | (col_ids == tgt[:, j:j + 1])

    if not from_logits:
        # NLL on log-probs: one fused select + a single full-tile reduction.
        out_ref[...] += jnp.sum(jnp.where(hit & row_valid, x, 0.0),
                                keepdims=True)
    else:
        # Fused log_softmax + NLL (group == 1 on this path).
        m = jnp.max(x, axis=1, keepdims=True)
        lse = m + jnp.log(jnp.sum(jnp.exp(x - m), axis=1, keepdims=True))
        picked = jnp.sum(jnp.where(hit, x, 0.0), axis=1, keepdims=True)
        ok = row_valid & (tgt[:, 0:1] >= 0)   # OOR targets were mapped to -1
        out_ref[...] += jnp.sum(jnp.where(ok, picked - lse, 0.0),
                                keepdims=True)


def get_loss_pallas(pred, target, trans_feat=None, *, from_logits=False,
                    lane_pack=True, max_tile_rows=None, num_core_splits=2):
    """Pallas equivalent of get_loss.forward: F.nll_loss(pred, target) (mean).

    pred:   (N, C) log-probabilities (f32/bf16); raw logits if from_logits=True
            (log_softmax is then fused into the kernel).
    target: (N,) integer class indices.
    trans_feat: accepted for signature parity; unused (as in the PyTorch module).
    """
    del trans_feat  # unused in the reference module's forward
    n, c = pred.shape

    # ---- Lane packing: fold `group` rows into one 128-lane kernel row (C<<128).
    group = 1
    if lane_pack and not from_logits:
        for g in range(min(128 // max(c, 1), 8), 1, -1):
            if n % g == 0:
                group = g
                break
    rows, width = n // group, group * c

    pred_k = pred if group == 1 else pred.reshape(rows, width)   # free reshape
    tgt = target.astype(jnp.int32)
    # Flat column index of each row's class inside its packed row; out-of-range
    # targets -> -1 so they never match a lane (contribute exactly 0).
    sub = jnp.arange(n, dtype=jnp.int32) % group
    flat_tgt = jnp.where((tgt >= 0) & (tgt < c), tgt + sub * c, -1)
    tgt_k = flat_tgt.reshape(rows, group)

    # ---- Byte-based tile sizing (pred + target, lane-padded, double-buffered).
    itemsize = jnp.dtype(pred.dtype).itemsize
    pred_row_b = (-(-width // 128) * 128) * itemsize
    tgt_row_b = 128 * 4                          # (tile_n, group) i32 pads to 128 lanes
    row_b = 2 * (pred_row_b + tgt_row_b)         # x2: double-buffered inputs

    vmem_limit = int(min((3 * _vmem_capacity_bytes()) // 4, 96 * _MIB))
    tile_budget = (3 * vmem_limit) // 5          # headroom for f32 upcast / masks
    tile_cap = max(8, ((tile_budget // row_b) // 8) * 8)
    if max_tile_rows is not None:                # (test hook) force small tiles
        tile_cap = min(tile_cap, max(8, (max_tile_rows // 8) * 8))

    if rows <= tile_cap:
        tile_n, num_tiles = rows, 1
    else:
        tile_n = tile_cap
        num_tiles = -(-rows // tile_n)

    # ---- 2-D grid: leading "parallel" axis splits tiles across TensorCores.
    splits = max(1, min(num_core_splits, num_tiles))
    tiles_per_core = -(-num_tiles // splits)
    needs_clamp = splits * tiles_per_core != num_tiles
    last_block = num_tiles - 1

    def row_block(ci, ti):
        lin = ci * tiles_per_core + ti
        if needs_clamp:                          # spare tile -> duplicate last block,
            lin = jnp.minimum(lin, last_block)   # fully masked inside the kernel
        return (lin, 0)

    kernel = functools.partial(
        _nll_loss_kernel, n_rows=rows, tile_n=tile_n,
        tiles_per_core=tiles_per_core, group=group, from_logits=from_logits)

    partials = pl.pallas_call(
        kernel,
        out_shape=jax.ShapeDtypeStruct((splits, 8, 128), jnp.float32),
        grid_spec=pltpu.PrefetchScalarGridSpec(
            num_scalar_prefetch=0,
            grid=(splits, tiles_per_core),
            in_specs=[
                pl.BlockSpec((tile_n, width), row_block),
                pl.BlockSpec((tile_n, group), row_block),
            ],
            # Per-core (8,128)-aligned lane-dense partial; block index constant
            # along the reduction axis -> VMEM-resident accumulator, no scratch.
            out_specs=pl.BlockSpec((1, 8, 128), lambda ci, ti: (ci, 0, 0)),
        ),
        compiler_params=pltpu.CompilerParams(
            dimension_semantics=("parallel", "arbitrary"),
            vmem_limit_bytes=vmem_limit),
    )(pred_k, tgt_k)

    # nll_loss(reduction='mean'): -(1/N) * sum_i log p[i, target_i].
    return -jnp.sum(partials[:, 0, 0]) * (1.0 / n)


if __name__ == "__main__":
    key = jax.random.PRNGKey(0)
    k_logits, k_target, k_tf, k2a, k2b, k3a, k3b = jax.random.split(key, 7)

    # Typical PointNet++ classifier shape: small batch, 40 ModelNet classes.
    N, C = 24, 40
    logits = jax.random.normal(k_logits, (N, C), dtype=jnp.float32)
    pred = jax.nn.log_softmax(logits, axis=-1)          # log-probs, as the model emits
    target = jax.random.randint(k_target, (N,), 0, C, dtype=jnp.int32)
    trans_feat = jax.random.normal(k_tf, (N, 3, 3), dtype=jnp.float32)  # unused

    ref = -jnp.mean(pred[jnp.arange(N), target])

    # 1) Exact module semantics: nll_loss on log-probs (lane-packed, group=3).
    loss = get_loss_pallas(pred, target, trans_feat)
    jax.block_until_ready(loss)
    assert jnp.allclose(loss, ref, atol=1e-6, rtol=1e-5), (loss, ref)

    # 2) Fused log_softmax + NLL straight from raw logits.
    loss_fused = get_loss_pallas(logits, target, trans_feat, from_logits=True)
    jax.block_until_ready(loss_fused)
    assert jnp.allclose(loss_fused, ref, atol=1e-5, rtol=1e-5), (loss_fused, ref)

    # 3) bf16 pred, upcast in-register inside the kernel.
    loss_bf16 = get_loss_pallas(pred.astype(jnp.bfloat16), target, trans_feat)
    jax.block_until_ready(loss_bf16)
    assert jnp.allclose(loss_bf16, ref, atol=3e-2, rtol=3e-2), (loss_bf16, ref)

    # 4) Multi-tile grid + 2-way core split + ragged tail + clamped spare tile.
    N2 = 60
    pred2 = jax.nn.log_softmax(
        jax.random.normal(k2a, (N2, C), dtype=jnp.float32), axis=-1)
    tgt2 = jax.random.randint(k2b, (N2,), 0, C, dtype=jnp.int32)
    loss2 = get_loss_pallas(pred2, tgt2, None, max_tile_rows=8)
    jax.block_until_ready(loss2)
    ref2 = -jnp.mean(pred2[jnp.arange(N2), tgt2])
    assert jnp.allclose(loss2, ref2, atol=1e-5, rtol=1e-5), (loss2, ref2)

    # 5) Wide-class path (C > 128 -> no lane packing), single full-extent tile.
    N3, C3 = 20, 136
    pred3 = jax.nn.log_softmax(
        jax.random.normal(k3a, (N3, C3), dtype=jnp.float32), axis=-1)
    tgt3 = jax.random.randint(k3b, (N3,), 0, C3, dtype=jnp.int32)
    loss3 = get_loss_pallas(pred3, tgt3, None)
    jax.block_until_ready(loss3)
    ref3 = -jnp.mean(pred3[jnp.arange(N3), tgt3])
    assert jnp.allclose(loss3, ref3, atol=1e-5, rtol=1e-5), (loss3, ref3)

    print("KERNEL_OK")
</pallas_src>

<mosaic_0001>
module attributes {stable_mosaic.version = 11 : i64} {
  func.func @_nll_loss_kernel(%arg0: i32, %arg1: i32, %arg2: memref<8x120xf32, #tpu.memory_space<vmem>>, %arg3: memref<8x3xi32, #tpu.memory_space<vmem>>, %arg4: memref<1x8x128xf32, #tpu.memory_space<vmem>>) attributes {dimension_semantics = [#tpu.dimension_semantics<parallel>, #tpu.dimension_semantics<arbitrary>], iteration_bounds = array<i64: 1, 1>, scalar_prefetch = 0 : i64, scratch_operands = 0 : i64, tpu.core_type = #tpu.core_type<tc>, window_params = [{transform_indices = @transform_0, window_bounds = array<i64: 8, 120>}, {transform_indices = @transform_1, window_bounds = array<i64: 8, 3>}, {transform_indices = @transform_2, window_bounds = array<i64: 1, 8, 128>}]} {
    %c0_i32 = arith.constant 0 : i32
    %0 = arith.cmpi eq, %arg1, %c0_i32 : i32
    %1 = arith.extui %0 : i1 to i32
    %c0_i32_0 = arith.constant 0 : i32
    %2 = arith.cmpi ne, %1, %c0_i32_0 : i32
    scf.if %2 {
      %cst_12 = arith.constant 0.000000e+00 : f32
      %39 = vector.broadcast %cst_12 : f32 to vector<1x8x128xf32>
      %c0_13 = arith.constant 0 : index
      %c0_14 = arith.constant 0 : index
      %c0_15 = arith.constant 0 : index
      %40 = vector.load %arg4[%c0_13, %c0_14, %c0_15] : memref<1x8x128xf32, #tpu.memory_space<vmem>>, vector<1x8x128xf32>
      tpu.vector_store %arg4[%c0_13, %c0_14, %c0_15], %39 {strides = array<i32>} : memref<1x8x128xf32, #tpu.memory_space<vmem>>, vector<1x8x128xf32>,
    } else {
    }
    %c0 = arith.constant 0 : index
    %c0_1 = arith.constant 0 : index
    %3 = vector.load %arg2[%c0, %c0_1] : memref<8x120xf32, #tpu.memory_space<vmem>>, vector<8x120xf32>
    %c0_2 = arith.constant 0 : index
    %c0_3 = arith.constant 0 : index
    %4 = vector.load %arg3[%c0_2, %c0_3] : memref<8x3xi32, #tpu.memory_space<vmem>>, vector<8x3xi32>
    %c1_i32 = arith.constant 1 : i32
    %5 = arith.muli %arg0, %c1_i32 : i32
    %6 = arith.addi %5, %arg1 : i32
    %c8_i32 = arith.constant 8 : i32
    %7 = arith.muli %6, %c8_i32 : i32
    %8 = tpu.iota {dimensions = array<i32: 0>} : vector<8x1xi32>
    %9 = vector.broadcast %7 : i32 to vector<8x1xi32>
    %10 = arith.addi %9, %8 : vector<8x1xi32>
    %c8_i32_4 = arith.constant 8 : i32
    %11 = vector.broadcast %c8_i32_4 : i32 to vector<8x1xi32>
    %12 = arith.cmpi slt, %10, %11 : vector<8x1xi32>
    %13 = tpu.iota {dimensions = array<i32: 1>} : vector<8x120xi32>
    %14 = vector.extract_strided_slice %4 {offsets = [0, 0], sizes = [8, 1], strides = [1, 1]} : vector<8x3xi32> to vector<8x1xi32>
    %15 = vector.broadcast %14 : vector<8x1xi32> to vector<8x120xi32>
    %16 = arith.cmpi eq, %13, %15 : vector<8x120xi32>
    %17 = vector.extract_strided_slice %4 {offsets = [0, 1], sizes = [8, 1], strides = [1, 1]} : vector<8x3xi32> to vector<8x1xi32>
    %18 = vector.broadcast %17 : vector<8x1xi32> to vector<8x120xi32>
    %19 = arith.cmpi eq, %13, %18 : vector<8x120xi32>
    %20 = arith.ori %16, %19 : vector<8x120xi1>
    %21 = vector.extract_strided_slice %4 {offsets = [0, 2], sizes = [8, 1], strides = [1, 1]} : vector<8x3xi32> to vector<8x1xi32>
    %22 = vector.broadcast %21 : vector<8x1xi32> to vector<8x120xi32>
    %23 = arith.cmpi eq, %13, %22 : vector<8x120xi32>
    %24 = arith.ori %20, %23 : vector<8x120xi1>
    %c0_5 = arith.constant 0 : index
    %c0_6 = arith.constant 0 : index
    %c0_7 = arith.constant 0 : index
    %25 = vector.load %arg4[%c0_5, %c0_6, %c0_7] : memref<1x8x128xf32, #tpu.memory_space<vmem>>, vector<1x8x128xf32>
    %26 = vector.broadcast %12 : vector<8x1xi1> to vector<8x120xi1>
    %27 = arith.andi %24, %26 : vector<8x120xi1>
    %cst = arith.constant 0.000000e+00 : f32
    %28 = vector.broadcast %cst : f32 to vector<8x120xf32>
    %29 = arith.select %27, %3, %28 : vector<8x120xi1>, vector<8x120xf32>
    %30 = vector.shape_cast %29 : vector<8x120xf32> to vector<1x8x120xf32>
    %cst_8 = arith.constant dense<0.000000e+00> : vector<1xf32>
    %31 = vector.multi_reduction <add>, %30, %cst_8 [1, 2] : vector<1x8x120xf32> to vector<1xf32>
    %32 = vector.shape_cast %31 : vector<1xf32> to vector<1x1x1xf32>
    %33 = vector.extract %32[0, 0, 0] : f32 from vector<1x1x1xf32>
    %34 = vector.broadcast %33 : f32 to vector<1x1xf32>
    %35 = vector.shape_cast %34 : vector<1x1xf32> to vector<1x1x1xf32>
    %36 = vector.broadcast %35 : vector<1x1x1xf32> to vector<1x8x128xf32>
    %37 = arith.addf %25, %36 : vector<1x8x128xf32>
    %c0_9 = arith.constant 0 : index
    %c0_10 = arith.constant 0 : index
    %c0_11 = arith.constant 0 : index
    %38 = vector.load %arg4[%c0_9, %c0_10, %c0_11] : memref<1x8x128xf32, #tpu.memory_space<vmem>>, vector<1x8x128xf32>
    tpu.vector_store %arg4[%c0_9, %c0_10, %c0_11], %37 {strides = array<i32>} : memref<1x8x128xf32, #tpu.memory_space<vmem>>, vector<1x8x128xf32>,
    return
  }
  func.func @transform_0(%arg0: i32, %arg1: i32) -> (i32, i32) {
    %c1_i32 = arith.constant 1 : i32
    %0 = arith.muli %arg0, %c1_i32 : i32
    %1 = arith.addi %0, %arg1 : i32
    %c0_i32 = arith.constant 0 : i32
    %c0_i32_0 = arith.constant 0 : i32
    return %1, %c0_i32 : i32, i32
  }
  func.func @transform_1(%arg0: i32, %arg1: i32) -> (i32, i32) {
    %c1_i32 = arith.constant 1 : i32
    %0 = arith.muli %arg0, %c1_i32 : i32
    %1 = arith.addi %0, %arg1 : i32
    %c0_i32 = arith.constant 0 : i32
    %c0_i32_0 = arith.constant 0 : i32
    return %1, %c0_i32 : i32, i32
  }
  func.func @transform_2(%arg0: i32, %arg1: i32) -> (i32, i32, i32) {
    %c0_i32 = arith.constant 0 : i32
    %c0_i32_0 = arith.constant 0 : i32
    %c0_i32_1 = arith.constant 0 : i32
    return %arg0, %c0_i32, %c0_i32_0 : i32, i32, i32
  }
}

</mosaic_0001>

<bundles_post_ra>
// kernel: tpu_custom_call.1
= control target key start
LH: loop header
LB: loop body
LE: loop exit
PB: predicated region body
PF: predicated region fallthrough
CT: control target
= control target key end

     0   :  { %s193_s0 = inlined_call_operand.vmem [shape: f32[8,120], index: 0, kind: input, shape index: {}]   ;;  %s194_s1 = inlined_call_operand.vmem [shape: s32[8,3], index: 1, kind: input, shape index: {}]   ;;  %s195_s2 = inlined_call_operand.hbm [shape: f32[1,8,128], index: 2, kind: output, shape index: {}]  }
   0x1   :  { %v52_v0 = vld [vmem:[%s194_s1] sm:$0xff] }
   0x2   :  { %7 = vsyncpa [#allocation3], 0  ;;  %v156_v1 = vmov 0   ;;  %v157_v2 = vmov 2   ;;  %v158_v3 = vmov 1   ;;  %v60_v4 = vlaneseq  ;;  %v51_v9 = vld [vmem:[%s193_s0] sm:$0xff] }
   0x3   :  { %128 = vset.pattern.permute.xlu0 %v156_v1  ;;  %130 = vset.pattern.permute.xlu1 %v157_v2  ;;  %vm81_vm4 = vcmask 982016   ;;  %s159_s12 = smov [#allocation2]  }
   0x4   :  { %63 = vperm.xlu0 %128, %v52_v0   ;;  %72 = vperm.xlu1 %130, %v52_v0   ;;  %v61_v6 = vand.u32 127, %v60_v4  ;;  %s101_s13 = sshll.u32 %s159_s12, 4  ;;  %s102_s13 = int_to_ptr.vmem [resolvable:$true] %s101_s13 }
   0x5   :  { %s132_s0 = scalar_lea.vmem %s102_s13, 128  ;;  %p137_p1 = scmp.lt.s32.totalorder %s102_s13, %s102_s13 }
   0x6   :  { %p133_p0 = scmp.ne.s32.totalorder %s102_s13, %s132_s0  ;;  %p138_p2 = scmp.lt.s32.totalorder %s132_s0, %s132_s0 }
   0x8   :  { %129 = vset.pattern.permute.xlu0 %v158_v3  ;;  %p139_p3 = por %p138_p2, %p137_p1 }
   0x9   :  { %67 = vperm.xlu0 %129, %v52_v0  }
   0xa   :  { %p140_p4 = pnand %p139_p3, %p133_p0 }
   0xd   :  { %131 = vset.pattern.permute.xlu0 %v157_v2 }
  0x83   :  { %v64_v5 = vpop.permute.xlu0 %63  ;;  %v73_v7 = vpop.permute.xlu1 %72 }
  0x84   :  { %vm74_vm0 = vcmp.eq.s32.totalorder %v61_v6, %v73_v7  ;;  %vm65_vm1 = vcmp.eq.s32.totalorder %v61_v6, %v64_v5 }
  0x88   :  { %v68_v8 = vpop.permute.xlu0 %67 }
  0x89   :  { %vm69_vm2 = vcmp.eq.s32.totalorder %v61_v6, %v68_v8 }
  0x8a   :  { %vm70_vm3 = vmor %vm65_vm1, %vm69_vm2 }
  0x8b   :  { %vm75_vm5 = vmor %vm70_vm3, %vm74_vm0 }
  0x8c   :  { %v80_v10 = vsel %vm75_vm5, %v51_v9, 0.0 }
  0x8d   :  { %v82_v11 = vsel %vm81_vm4, %v80_v10, 0.0 }
  0x8e   :  { %83 = vadd.xlane.f32.xlu1 %v82_v11 }
 0x11b   :  { %v84_v12 = vpop.xlane.xlu1 %83 }
 0x11c   :  { %v85_v13 = vrot.slane %v84_v12, 4 }
 0x11e   :  { %v86_v14 = vadd.f32 %v85_v13, %v84_v12 }
 0x120   :  { %v87_v15 = vrot.slane %v86_v14, 2 }
 0x122   :  { %v88_v16 = vadd.f32 %v87_v15, %v86_v14 }
 0x124   :  { %v89_v17 = vrot.slane %v88_v16, 1 }
 0x126   :  { %v90_v18 = vadd.f32 %v89_v17, %v88_v16 }
 0x128   :  { %121 = vpush %v90_v18 }
 0x159   :  { %s122_s14 = spop %121 }
 0x15a   :  { %v92_v19 = vstv %s122_s14 }
 0x15b   :  { %94 = vst [vmem:[#allocation2] sm:$0xff] %v92_v19 }
 0x15c   :  { %143 = shalt.err (!%p140_p4)
}
 0x15d   :  { %s144_s17 = scalar_lea.hbm %s195_s2, 128 }
 0x15e   :  { %p145_p5 = scmp.ne.s32.totalorder %s195_s2, %s144_s17  ;;  %p148_p6 = scmp.lt.u32.totalorder %s144_s17, %s195_s2 }
 0x160   :  { %p150_p7 = pnand %p148_p6, %p145_p5 }
 0x162   :  { %153 = shalt.err (!%p150_p7)
}
 0x163   :  { %104 = dma.vmem_to_hbm [thread:$0]  %s102_s13, 128, %s195_s2, [#allocation3]  }
 0x164   :  { %154 = dma.done.wait [#allocation3], 128  }
 0x165   :  { %155 = vsyncadd [#allocation3], 4294967168 }
 0x166   :  { %108 = vsyncpa [#allocation3], 1 }

</bundles_post_ra>
